<compile_context>
chip_gen: v5e
topology: v5e:2x2
jax: 0.10.0
libtpu: 0.0.40
codegen_flags: <defaults>
</compile_context>

<pallas_src>
import functools

import numpy as np
import jax
import jax.numpy as jnp
from jax import lax
from jax.experimental import pallas as pl
from jax.experimental.pallas import tpu as pltpu


def _pick_tile(L):
    """Largest lane-aligned point tile that divides L; prefer >=2 grid steps."""
    for c in (512, 256, 128):
        if L % c == 0 and L // c >= 2:
            return c
    for c in (512, 256, 128):
        if L % c == 0:
            return c
    return L  # small L: one full-extent block (legal: equals full array dim)


# ----------------------------------------------------------------------------
# Pallas kernel 1: fused multi-layer pointwise MLP
#   y = act_n(W_n @ ... act_1(W_1 @ X + b_1) ... + b_n)   per batch slice
# acts: 0 identity, 1 ReLU, 2 LeakyReLU(0.1), 3 Sigmoid.
# Weights/activations are bf16 on the MXU; accumulation, bias and activation in
# f32.  All layer weights stay VMEM-resident across the grid (constant index_map).
# ----------------------------------------------------------------------------
def _fused_mlp_kernel(*refs, nb, acts):
    x_ref, o_ref = refs[0], refs[-1]
    wb = refs[1:-1]
    n_layers = len(acts)
    for b in range(nb):                       # nb is tiny & static -> unrolled
        h = x_ref[b]                          # (Cin, tl) bf16
        for i in range(n_layers):
            w = wb[2 * i][...]                # (Cout_i, Cin_i) bf16
            bias = wb[2 * i + 1][...]         # (Cout_i, 1)     f32
            y = jnp.dot(w, h, preferred_element_type=jnp.float32) + bias
            a = acts[i]
            if a == 1:
                y = jnp.maximum(y, 0.0)
            elif a == 2:
                y = jnp.where(y > 0.0, y, 0.1 * y)
            elif a == 3:
                y = jax.nn.sigmoid(y)
            h = y.astype(jnp.bfloat16) if i + 1 < n_layers else y
        o_ref[b] = h.astype(o_ref.dtype)


def fused_mlp(x, layers):
    """x: (B, Cin, L) -> (B, Cout_last, L); each layer = {'w','b','act'}."""
    B, cin, L = x.shape
    tl = _pick_tile(L)
    cout = layers[-1]["w"].shape[0]
    acts = tuple(int(lyr["act"]) for lyr in layers)

    in_specs = [pl.BlockSpec((B, cin, tl), lambda l: (0, 0, l))]
    args = [x.astype(jnp.bfloat16)]
    for lyr in layers:
        co, ci = lyr["w"].shape
        in_specs.append(pl.BlockSpec((co, ci), lambda l: (0, 0)))
        in_specs.append(pl.BlockSpec((co, 1), lambda l: (0, 0)))
        args.append(lyr["w"].astype(jnp.bfloat16))
        args.append(lyr["b"].reshape(co, 1).astype(jnp.float32))

    return pl.pallas_call(
        functools.partial(_fused_mlp_kernel, nb=B, acts=acts),
        out_shape=jax.ShapeDtypeStruct((B, cout, L), jnp.float32),
        grid=(L // tl,),
        in_specs=in_specs,
        out_specs=pl.BlockSpec((B, cout, tl), lambda l: (0, 0, l)),
        compiler_params=pltpu.CompilerParams(dimension_semantics=("parallel",)),
    )(*args)


# ----------------------------------------------------------------------------
# Pallas kernel 2: SA grouped SharedMLP fused with the neighbor max-pool.
# Input layout (K, Cg, G): neighbors on the leading (un-tiled) axis, channels on
# sublanes, centers on lanes.  Per neighbor k: run the SharedMLP on the
# (Cg, g_tile) slab; running element-wise max over k -> (Cout, g_tile).
# The (B, Cout, M*K) intermediate of the old version never exists in HBM.
# ----------------------------------------------------------------------------
def _sa_mlp_max_kernel(*refs, K):
    x_ref, o_ref = refs[0], refs[-1]
    wb = refs[1:-1]
    n_layers = len(wb) // 2
    acc = None
    for k in range(K):                        # static unroll over neighbors
        h = x_ref[k]                          # (Cg, g_tile) bf16
        for i in range(n_layers):
            w = wb[2 * i][...]
            bias = wb[2 * i + 1][...]
            y = jnp.dot(w, h, preferred_element_type=jnp.float32) + bias
            y = jnp.maximum(y, 0.0)           # SharedMLP = Conv + BN + ReLU
            h = y.astype(jnp.bfloat16) if i + 1 < n_layers else y
        acc = h if acc is None else jnp.maximum(acc, h)
    o_ref[...] = acc.astype(o_ref.dtype)


def sa_mlp_max(grouped, layers):
    """grouped: (K, Cg, G) -> (Cout, G): SharedMLP per point, max over K neighbors."""
    K, cg, G = grouped.shape
    g_tile = _pick_tile(G)
    cout = layers[-1]["w"].shape[0]

    in_specs = [pl.BlockSpec((K, cg, g_tile), lambda g: (0, 0, g))]
    args = [grouped.astype(jnp.bfloat16)]
    for lyr in layers:
        co, ci = lyr["w"].shape
        in_specs.append(pl.BlockSpec((co, ci), lambda g: (0, 0)))
        in_specs.append(pl.BlockSpec((co, 1), lambda g: (0, 0)))
        args.append(lyr["w"].astype(jnp.bfloat16))
        args.append(lyr["b"].reshape(co, 1).astype(jnp.float32))

    return pl.pallas_call(
        functools.partial(_sa_mlp_max_kernel, K=K),
        out_shape=jax.ShapeDtypeStruct((cout, G), jnp.float32),
        grid=(G // g_tile,),
        in_specs=in_specs,
        out_specs=pl.BlockSpec((cout, g_tile), lambda g: (0, g)),
        compiler_params=pltpu.CompilerParams(dimension_semantics=("parallel",)),
    )(*args)


# ----------------------------------------------------------------------------
# PVConv pieces (voxelize / conv3d-as-im2col / SE3d / trilinear devoxelize)
# ----------------------------------------------------------------------------
def voxelize(features, coords, R):
    # TODO(synk): scatter-average voxelization is data-dependent scatter glue; kept in plain JAX.
    B, C, N = features.shape
    nc = coords - jnp.mean(coords, axis=2, keepdims=True)
    norm = jnp.sqrt(jnp.sum(nc * nc, axis=1, keepdims=True))               # (B,1,N)
    nc = nc / (jnp.max(norm, axis=2, keepdims=True) * 2.0) + 0.5
    nc = jnp.clip(nc * R, 0.0, R - 1)
    vox = jnp.round(nc).astype(jnp.int32)
    flat = (vox[:, 0] * R + vox[:, 1]) * R + vox[:, 2]                     # (B,N)

    def scatter_mean(f, idx):
        sums = jnp.zeros((R * R * R, C), jnp.float32).at[idx].add(f.T)
        cnt = jnp.zeros((R * R * R,), jnp.float32).at[idx].add(1.0)
        return (sums / jnp.maximum(cnt, 1.0)[:, None]).T

    vf = jax.vmap(scatter_mean)(features, flat)                            # (B,C,R^3)
    return vf.reshape(B, C, R, R, R), nc


def trilinear_devoxelize(vox, nc, R):
    B, C = vox.shape[0], vox.shape[1]
    N = nc.shape[2]
    v = vox.reshape(B, C, R * R * R)
    lo_f = jnp.clip(jnp.floor(nc), 0.0, R - 1)
    frac = nc - lo_f
    lo = lo_f.astype(jnp.int32)
    hi = jnp.clip(lo + 1, 0, R - 1)
    out = jnp.zeros((B, C, N), jnp.float32)
    for dx in (0, 1):
        wx = frac[:, 0] if dx else 1.0 - frac[:, 0]
        ix = hi[:, 0] if dx else lo[:, 0]
        for dy in (0, 1):
            wy = frac[:, 1] if dy else 1.0 - frac[:, 1]
            iy = hi[:, 1] if dy else lo[:, 1]
            for dz in (0, 1):
                wz = frac[:, 2] if dz else 1.0 - frac[:, 2]
                iz = hi[:, 2] if dz else lo[:, 2]
                flat = (ix * R + iy) * R + iz                              # (B,N)
                g = jnp.take_along_axis(v, flat[:, None, :], axis=2)       # (B,C,N)
                out = out + (wx * wy * wz)[:, None, :] * g
    return out


def conv3d_bn_lrelu(x, lyr):
    # 3x3x3 Conv3d + BN + LeakyReLU(0.1): im2col in JAX, fused matmul in Pallas.
    # TODO(synk): an accumulating 27-tap Pallas kernel would avoid the 27x im2col
    # HBM blow-up at full voxel resolution; at these small grids it is negligible.
    B, C, R = x.shape[0], x.shape[1], x.shape[2]
    xp = jnp.pad(x, ((0, 0), (0, 0), (1, 1), (1, 1), (1, 1)))
    cols = []
    for kd in range(3):
        for kh in range(3):
            for kw in range(3):
                cols.append(xp[:, :, kd:kd + R, kh:kh + R, kw:kw + R].reshape(B, C, R ** 3))
    col = jnp.stack(cols, axis=2).reshape(B, C * 27, R ** 3)
    y = fused_mlp(col, [lyr])                                              # one Pallas call
    co = lyr["w"].shape[0]
    return y.reshape(B, co, R, R, R)


def apply_se3d(x, se):
    # Tiny squeeze-excite (L == batch): kept in plain jnp so it fuses with the
    # surrounding mean/multiply instead of paying two Pallas launches.
    g = jnp.mean(x, axis=(2, 3, 4))                                        # (B,C)
    h = jax.nn.relu(g @ se["w1"].T)                                        # (B,C/8)
    s = jax.nn.sigmoid(h @ se["w2"].T)                                     # (B,C)
    return x * s[:, :, None, None, None]


def apply_pvconv(features, coords, p):
    R = p["R"]
    vox, nc = voxelize(features, coords, R)
    h = conv3d_bn_lrelu(vox, p["conv1"])
    h = conv3d_bn_lrelu(h, p["conv2"])
    h = apply_se3d(h, p["se"])
    voxel_point_feat = trilinear_devoxelize(h, nc, R)
    point_feat = fused_mlp(features, p["point"])
    return voxel_point_feat + point_feat, coords


# ----------------------------------------------------------------------------
# PointNet++ set-abstraction / feature-propagation pieces
# ----------------------------------------------------------------------------
def farthest_point_sample(coords, m):
    # TODO(synk): FPS is sequential index selection (glue); kept in plain JAX.
    B, _, N = coords.shape
    pts = jnp.transpose(coords, (0, 2, 1))                                 # (B,N,3)
    d0 = jnp.sum((pts - pts[:, :1, :]) ** 2, axis=-1)                      # (B,N)
    idx0 = jnp.zeros((B, m), jnp.int32)

    def body(i, carry):
        mind, idxs = carry
        nxt = jnp.argmax(mind, axis=1).astype(jnp.int32)
        idxs = idxs.at[:, i].set(nxt)
        npos = jnp.take_along_axis(pts, nxt[:, None, None], axis=1)        # (B,1,3)
        d = jnp.sum((pts - npos) ** 2, axis=-1)
        return jnp.minimum(mind, d), idxs

    _, idxs = lax.fori_loop(1, m, body, (d0, idx0))
    centers = jnp.take_along_axis(pts, idxs[:, :, None], axis=1)           # (B,m,3)
    return jnp.transpose(centers, (0, 2, 1))


def ball_query_group(coords, centers, features, radius, k):
    """Returns grouped tensor in (K, Cg, B*M) layout for the fused SA kernel."""
    B, _, N = coords.shape
    pts = jnp.transpose(coords, (0, 2, 1))
    ctr = jnp.transpose(centers, (0, 2, 1))
    d2 = jnp.sum((ctr[:, :, None, :] - pts[:, None, :, :]) ** 2, axis=-1)  # (B,M,N)
    in_ball = d2 < (radius * radius)
    key = jnp.where(in_ball, jnp.arange(N, dtype=jnp.int32)[None, None, :], N)
    skey = jnp.sort(key, axis=-1)[:, :, :k]                                # first k in-ball ids
    first = skey[:, :, :1]
    idx = jnp.where(skey < N, skey, jnp.where(first < N, first, 0)).astype(jnp.int32)
    M = idx.shape[1]
    flat = idx.reshape(B, M * k)
    nb_coords = jnp.take_along_axis(coords, flat[:, None, :], axis=2).reshape(B, 3, M, k)
    nb_feats = jnp.take_along_axis(features, flat[:, None, :], axis=2).reshape(
        B, features.shape[1], M, k)
    rel = nb_coords - centers[:, :, :, None]
    grouped = jnp.concatenate([rel, nb_feats], axis=1)                     # (B, Cg, M, k)
    cg = grouped.shape[1]
    return jnp.transpose(grouped, (3, 1, 0, 2)).reshape(k, cg, B * M)      # (K, Cg, B*M)


def apply_sa_module(features, coords, sa):
    B = features.shape[0]
    M = sa["num_centers"]
    centers = farthest_point_sample(coords, M)
    grouped = ball_query_group(coords, centers, features, sa["radius"], sa["K"])
    out = sa_mlp_max(grouped, sa["mlp"])                                   # (Cout, B*M) Pallas
    co = out.shape[0]
    out = jnp.transpose(out.reshape(co, B, M), (1, 0, 2))                  # (B, Cout, M)
    return out, centers


def nn_interpolate(points_coords, centers_coords, centers_features):
    pd = jnp.transpose(points_coords, (0, 2, 1))                           # (B,Nd,3)
    cd = jnp.transpose(centers_coords, (0, 2, 1))                          # (B,Nc,3)
    d2 = jnp.sum((pd[:, :, None, :] - cd[:, None, :, :]) ** 2, axis=-1)
    neg, idx = lax.top_k(-d2, 3)                                           # 3 nearest
    dist = -neg
    w = 1.0 / (dist + 1e-8)
    w = w / jnp.sum(w, axis=-1, keepdims=True)
    B, Nd, _ = idx.shape
    flat = idx.reshape(B, Nd * 3)
    g = jnp.take_along_axis(centers_features, flat[:, None, :], axis=2)
    g = g.reshape(B, centers_features.shape[1], Nd, 3)
    return jnp.sum(g * w[:, None, :, :], axis=-1)                          # (B,C,Nd)


# ----------------------------------------------------------------------------
# Deterministic parameter construction (mirrors PVCNN2.__init__ shapes)
# ----------------------------------------------------------------------------
class KeyGen:
    def __init__(self, seed):
        self._key = jax.random.PRNGKey(seed)

    def __call__(self):
        self._key, sub = jax.random.split(self._key)
        return sub


def _normal(kg, shape, scale):
    return scale * jax.random.normal(kg(), shape, dtype=jnp.float32)


def _fold_bn(w, b, gamma, beta, eps):
    # TODO(synk): BN folded with inference-mode running stats (mean=0, var=1),
    # not training-mode batch statistics.
    scale = gamma / jnp.sqrt(1.0 + eps)
    return w * scale[:, None], b * scale + beta


def init_conv_bn(kg, cin, cout, eps=1e-5, act=1):
    w = _normal(kg, (cout, cin), 1.0 / np.sqrt(cin))
    b = _normal(kg, (cout,), 0.01)
    gamma = 1.0 + _normal(kg, (cout,), 0.05)
    beta = _normal(kg, (cout,), 0.05)
    w, b = _fold_bn(w, b, gamma, beta, eps)
    return {"w": w, "b": b, "act": act}


def init_shared_mlp(kg, cin, couts):
    layers = []
    for co in couts:
        layers.append(init_conv_bn(kg, cin, co, eps=1e-5, act=1))
        cin = co
    return layers


def init_conv3d_bn(kg, cin, cout):
    w = _normal(kg, (cout, cin, 3, 3, 3), 1.0 / np.sqrt(cin * 27))
    b = _normal(kg, (cout,), 0.01)
    gamma = 1.0 + _normal(kg, (cout,), 0.05)
    beta = _normal(kg, (cout,), 0.05)
    scale = gamma / jnp.sqrt(1.0 + 1e-5)
    w = (w * scale[:, None, None, None, None]).reshape(cout, cin * 27)
    return {"w": w, "b": b * scale + beta, "act": 2}       # LeakyReLU(0.1)


def init_se(kg, c, reduction=8):
    cr = max(c // reduction, 1)
    return {"w1": _normal(kg, (cr, c), 1.0 / np.sqrt(c)),
            "w2": _normal(kg, (c, cr), 1.0 / np.sqrt(cr))}


def init_pvconv(kg, cin, cout, resolution):
    return {"R": resolution,
            "conv1": init_conv3d_bn(kg, cin, cout),
            "conv2": init_conv3d_bn(kg, cout, cout),
            "se": init_se(kg, cout),
            "point": init_shared_mlp(kg, cin, [cout])}


SA_BLOCKS = [((32, 2, 32), (1024, 0.1, 32, (32, 64))),
             ((64, 3, 16), (256, 0.2, 32, (64, 128))),
             ((128, 3, 8), (64, 0.4, 32, (128, 256))),
             (None, (16, 0.8, 32, (256, 256)))]
FP_BLOCKS = [((256, 256), (256, 1, 8)),
             ((256, 256), (256, 1, 8)),
             ((256, 128), (128, 2, 16)),
             ((128, 128, 64), (64, 1, 32))]


def init_params(seed, num_classes, extra_feature_channels=3,
                width_multiplier=1, voxel_resolution_multiplier=1.0):
    kg = KeyGen(seed)
    r, vr = width_multiplier, voxel_resolution_multiplier

    in_channels = extra_feature_channels + 3
    efc = extra_feature_channels
    sa_layers, sa_in_channels = [], []
    for conv_cfg, sa_cfg in SA_BLOCKS:
        sa_in_channels.append(in_channels)
        pvconvs = []
        if conv_cfg is not None:
            oc, nb, vres = conv_cfg
            oc = int(r * oc)
            for _ in range(nb):
                pvconvs.append(init_pvconv(kg, in_channels, oc, max(int(vr * vres), 1)))
                in_channels = oc
            efc = in_channels
        num_centers, radius, K, ocs = sa_cfg
        ocs = [int(r * o) for o in ocs]
        mlp = init_shared_mlp(kg, efc + 3, ocs)          # +3 relative coordinates
        sa_layers.append({"pvconvs": pvconvs,
                          "sa": {"num_centers": num_centers, "radius": float(radius),
                                 "K": K, "mlp": mlp}})
        in_channels = efc = ocs[-1]

    channels_sa = in_channels
    sa_in_channels[0] = extra_feature_channels

    z_mean = init_shared_mlp(kg, channels_sa, [channels_sa])
    z_var = init_shared_mlp(kg, channels_sa, [channels_sa])

    fp_layers = []
    in_channels = channels_sa
    for fp_idx, (fp_cfg, conv_cfg) in enumerate(FP_BLOCKS):
        ocs = [int(r * o) for o in fp_cfg]
        fp_mlp = init_shared_mlp(kg, in_channels + sa_in_channels[-1 - fp_idx], ocs)
        in_channels = ocs[-1]
        pvconvs = []
        if conv_cfg is not None:
            oc, nb, vres = conv_cfg
            oc = int(r * oc)
            for _ in range(nb):
                pvconvs.append(init_pvconv(kg, in_channels, oc, max(int(vr * vres), 1)))
                in_channels = oc
        fp_layers.append({"fp_mlp": fp_mlp, "pvconvs": pvconvs})

    # Classifier: SharedMLP(128) + Dropout(identity in eval) + Conv1d(num_classes),
    # Sigmoid normalizer fused into the final layer activation.
    cls_layers = init_shared_mlp(kg, in_channels, [int(r * 128)])
    cls_w = _normal(kg, (num_classes, int(r * 128)), 1.0 / np.sqrt(int(r * 128)))
    cls_b = _normal(kg, (num_classes,), 0.01)
    cls_layers.append({"w": cls_w, "b": cls_b, "act": 3})

    return {"sa_layers": sa_layers, "z_mean": z_mean, "z_var": z_var,
            "fp_layers": fp_layers, "classifier": cls_layers}


# ----------------------------------------------------------------------------
# Full PVCNN2 forward
# ----------------------------------------------------------------------------
def pvcnn2_forward(params, inputs, rng):
    coords = inputs[:, :3, :]
    features = inputs
    coords_list, in_features_list = [], []

    for blk in params["sa_layers"]:
        in_features_list.append(features)
        coords_list.append(coords)
        for pv in blk["pvconvs"]:
            features, coords = apply_pvconv(features, coords, pv)
        features, coords = apply_sa_module(features, coords, blk["sa"])
    in_features_list[0] = inputs[:, 3:, :]

    latent_mean = fused_mlp(features, params["z_mean"])
    latent_var = fused_mlp(features, params["z_var"])
    eps = jax.random.normal(rng, latent_var.shape, dtype=jnp.float32)
    latent = latent_mean + jnp.exp(0.5 * latent_var) * eps      # reparameterization

    for fp_idx, blk in enumerate(params["fp_layers"]):
        pts_coords = coords_list[-1 - fp_idx]
        skip = in_features_list[-1 - fp_idx]
        interp = nn_interpolate(pts_coords, coords, latent)
        latent = fused_mlp(jnp.concatenate([interp, skip], axis=1), blk["fp_mlp"])
        coords = pts_coords
        for pv in blk["pvconvs"]:
            latent, coords = apply_pvconv(latent, coords, pv)

    # TODO(synk): Dropout(0.5) inside the classifier is identity in eval mode.
    out = fused_mlp(latent, params["classifier"])               # SharedMLP + Conv1d + Sigmoid
    return out, latent_mean, latent_var


if __name__ == "__main__":
    B, N, NUM_CLASSES = 2, 1024, 3
    key = jax.random.PRNGKey(0)
    k_in, k_eps = jax.random.split(key)
    inputs = jax.random.normal(k_in, (B, 6, N), dtype=jnp.float32)   # (B, 3 coords + 3 extra, N)

    params = init_params(seed=42, num_classes=NUM_CLASSES,
                         extra_feature_channels=3,
                         width_multiplier=1,
                         voxel_resolution_multiplier=0.25)           # small voxel grids for test

    out, mu, logvar = pvcnn2_forward(params, inputs, k_eps)
    jax.block_until_ready((out, mu, logvar))

    assert out.shape == (B, NUM_CLASSES, N)
    assert mu.shape == (B, 256, 16) and logvar.shape == (B, 256, 16)
    assert bool(jnp.all(jnp.isfinite(out)))
    print("KERNEL_OK")
</pallas_src>

<mosaic_0001>
module attributes {stable_mosaic.version = 11 : i64} {
  func.func @_fused_mlp_kernel(%arg0: i32, %arg1: memref<2x162x256xbf16, #tpu.memory_space<vmem>>, %arg2: memref<32x162xbf16, #tpu.memory_space<vmem>>, %arg3: memref<32x1xf32, #tpu.memory_space<vmem>>, %arg4: memref<2x32x256xf32, #tpu.memory_space<vmem>>) attributes {dimension_semantics = [#tpu.dimension_semantics<parallel>], iteration_bounds = array<i64: 2>, scalar_prefetch = 0 : i64, scratch_operands = 0 : i64, tpu.core_type = #tpu.core_type<tc>, window_params = [{transform_indices = @transform_0, window_bounds = array<i64: 2, 162, 256>}, {pipeline_mode = #tpu.pipeline_mode<synchronous>, transform_indices = @transform_1, window_bounds = array<i64: 32, 162>}, {pipeline_mode = #tpu.pipeline_mode<synchronous>, transform_indices = @transform_2, window_bounds = array<i64: 32, 1>}, {transform_indices = @transform_3, window_bounds = array<i64: 2, 32, 256>}]} {
    %c0 = arith.constant 0 : index
    %c0_0 = arith.constant 0 : index
    %c0_1 = arith.constant 0 : index
    %0 = vector.load %arg1[%c0, %c0_0, %c0_1] : memref<2x162x256xbf16, #tpu.memory_space<vmem>>, vector<1x162x256xbf16>
    %1 = vector.shape_cast %0 : vector<1x162x256xbf16> to vector<162x256xbf16>
    %c0_2 = arith.constant 0 : index
    %c0_3 = arith.constant 0 : index
    %2 = vector.load %arg2[%c0_2, %c0_3] : memref<32x162xbf16, #tpu.memory_space<vmem>>, vector<32x162xbf16>
    %c0_4 = arith.constant 0 : index
    %c0_5 = arith.constant 0 : index
    %3 = vector.load %arg3[%c0_4, %c0_5] : memref<32x1xf32, #tpu.memory_space<vmem>>, vector<32x1xf32>
    %cst = arith.constant dense<0.000000e+00> : vector<32x256xf32>
    %4 = tpu.matmul %2, %1, %cst {dimension_numbers = #tpu.dot_dimension_numbers<[1], [0], [0], [1], [0, 0, 1, 1], [], []>} : vector<32x162xbf16>, vector<162x256xbf16>, vector<32x256xf32> -> vector<32x256xf32>
    %5 = vector.broadcast %3 : vector<32x1xf32> to vector<32x256xf32>
    %6 = arith.addf %4, %5 : vector<32x256xf32>
    %cst_6 = arith.constant 0.000000e+00 : f32
    %7 = vector.broadcast %cst_6 : f32 to vector<32x256xf32>
    %8 = arith.cmpf ogt, %6, %7 : vector<32x256xf32>
    %cst_7 = arith.constant 1.000000e-01 : f32
    %9 = vector.broadcast %cst_7 : f32 to vector<32x256xf32>
    %10 = arith.mulf %9, %6 : vector<32x256xf32>
    %11 = arith.select %8, %6, %10 : vector<32x256xi1>, vector<32x256xf32>
    %c0_8 = arith.constant 0 : index
    %c0_9 = arith.constant 0 : index
    %c0_10 = arith.constant 0 : index
    %12 = vector.load %arg4[%c0_8, %c0_9, %c0_10] : memref<2x32x256xf32, #tpu.memory_space<vmem>>, vector<1x32x256xf32>
    %13 = vector.shape_cast %12 : vector<1x32x256xf32> to vector<32x256xf32>
    %14 = vector.shape_cast %11 : vector<32x256xf32> to vector<1x32x256xf32>
    tpu.vector_store %arg4[%c0_8, %c0_9, %c0_10], %14 {strides = array<i32>} : memref<2x32x256xf32, #tpu.memory_space<vmem>>, vector<1x32x256xf32>,
    %c1 = arith.constant 1 : index
    %c0_11 = arith.constant 0 : index
    %c0_12 = arith.constant 0 : index
    %15 = vector.load %arg1[%c1, %c0_11, %c0_12] : memref<2x162x256xbf16, #tpu.memory_space<vmem>>, vector<1x162x256xbf16>
    %16 = vector.shape_cast %15 : vector<1x162x256xbf16> to vector<162x256xbf16>
    %c0_13 = arith.constant 0 : index
    %c0_14 = arith.constant 0 : index
    %17 = vector.load %arg2[%c0_13, %c0_14] : memref<32x162xbf16, #tpu.memory_space<vmem>>, vector<32x162xbf16>
    %c0_15 = arith.constant 0 : index
    %c0_16 = arith.constant 0 : index
    %18 = vector.load %arg3[%c0_15, %c0_16] : memref<32x1xf32, #tpu.memory_space<vmem>>, vector<32x1xf32>
    %cst_17 = arith.constant dense<0.000000e+00> : vector<32x256xf32>
    %19 = tpu.matmul %17, %16, %cst_17 {dimension_numbers = #tpu.dot_dimension_numbers<[1], [0], [0], [1], [0, 0, 1, 1], [], []>} : vector<32x162xbf16>, vector<162x256xbf16>, vector<32x256xf32> -> vector<32x256xf32>
    %20 = vector.broadcast %18 : vector<32x1xf32> to vector<32x256xf32>
    %21 = arith.addf %19, %20 : vector<32x256xf32>
    %cst_18 = arith.constant 0.000000e+00 : f32
    %22 = vector.broadcast %cst_18 : f32 to vector<32x256xf32>
    %23 = arith.cmpf ogt, %21, %22 : vector<32x256xf32>
    %cst_19 = arith.constant 1.000000e-01 : f32
    %24 = vector.broadcast %cst_19 : f32 to vector<32x256xf32>
    %25 = arith.mulf %24, %21 : vector<32x256xf32>
    %26 = arith.select %23, %21, %25 : vector<32x256xi1>, vector<32x256xf32>
    %c1_20 = arith.constant 1 : index
    %c0_21 = arith.constant 0 : index
    %c0_22 = arith.constant 0 : index
    %27 = vector.load %arg4[%c1_20, %c0_21, %c0_22] : memref<2x32x256xf32, #tpu.memory_space<vmem>>, vector<1x32x256xf32>
    %28 = vector.shape_cast %27 : vector<1x32x256xf32> to vector<32x256xf32>
    %29 = vector.shape_cast %26 : vector<32x256xf32> to vector<1x32x256xf32>
    tpu.vector_store %arg4[%c1_20, %c0_21, %c0_22], %29 {strides = array<i32>} : memref<2x32x256xf32, #tpu.memory_space<vmem>>, vector<1x32x256xf32>,
    return
  }
  func.func @transform_0(%arg0: i32) -> (i32, i32, i32) {
    %c0_i32 = arith.constant 0 : i32
    %c0_i32_0 = arith.constant 0 : i32
    %c0_i32_1 = arith.constant 0 : i32
    return %c0_i32, %c0_i32_0, %arg0 : i32, i32, i32
  }
  func.func @transform_1(%arg0: i32) -> (i32, i32) {
    %c0_i32 = arith.constant 0 : i32
    %c0_i32_0 = arith.constant 0 : i32
    %c0_i32_1 = arith.constant 0 : i32
    return %c0_i32, %c0_i32_0 : i32, i32
  }
  func.func @transform_2(%arg0: i32) -> (i32, i32) {
    %c0_i32 = arith.constant 0 : i32
    %c0_i32_0 = arith.constant 0 : i32
    %c0_i32_1 = arith.constant 0 : i32
    return %c0_i32, %c0_i32_0 : i32, i32
  }
  func.func @transform_3(%arg0: i32) -> (i32, i32, i32) {
    %c0_i32 = arith.constant 0 : i32
    %c0_i32_0 = arith.constant 0 : i32
    %c0_i32_1 = arith.constant 0 : i32
    return %c0_i32, %c0_i32_0, %arg0 : i32, i32, i32
  }
}

</mosaic_0001>

<bundles_post_ra>
// kernel: tpu_custom_call.1
= control target key start
LH: loop header
LB: loop body
LE: loop exit
PB: predicated region body
PF: predicated region fallthrough
CT: control target
= control target key end

     0   :  { %8 = vsyncpa [#allocation4], 0  ;;  %s1847_s0 = inlined_call_operand.vmem [shape: bf16[2,162,512], index: 0, kind: input, shape index: {}]   ;;  %s1848_s1 = inlined_call_operand.vmem [shape: bf16[32,162], index: 1, kind: input, shape index: {}]   ;;  %s1849_s2 = inlined_call_operand.vmem [shape: f32[32,1], index: 2, kind: input, shape index: {}]   ;;  %s1850_s3 = inlined_call_operand.hbm [shape: f32[2,32,512], index: 3, kind: output, shape index: {}]  }
   0x1   :  { %10 = vsyncpa [#allocation4 + $0x1], 0  ;;  %s1482_s12 = smov 0   ;;  %s1484_s13 = smov 0  }
   0x2   :  { %s1486_s14 = smov 0   ;;  %s1488_s15 = smov 0  }
   0x3 LB: > { %s1043_s16 = sadd.s32 4294967295, %s1456_s15   ;;  %s1044_s17 = sadd.s32 4294967294, %s1456_s15   ;;  %s1456_s15 = sphi %s1488_s15, %s1856_s15   ;;  %s1452_s14 = sphi %s1486_s14, %s1855_s14   ;;  %s1448_s13 = sphi %s1484_s13, %s1854_s13   ;;  %s1444_s12 = sphi %s1482_s12, %s1853_s12  }
   0x4   : > { %s1505_s18 = sadd.s32 1, %s1456_s15   ;;  %s23_s19 = sadd.s32 1, %s1452_s14 }
   0x5   : > { %s20_s20 = ssub.s32 %s1456_s15, %s1505_s18  ;;  %p30_p0 = scmp.ne.s32.totalorder %s1452_s14, %s1448_s13 }
   0x6   : > { %p21_p1 = scmp.eq.s32.totalorder %s20_s20, 0  ;;  %p31_p2 = scmp.eq.s32.totalorder %s1456_s15, 0 }
   0x7   : > { %p102_p3 = scmp.eq.s32.totalorder %s1043_s16, 1  ;;  %p107_p4 = scmp.ne.s32.totalorder %s1448_s13, %s1444_s12 }
   0x8   : > { %s1518_s21 = scalar_select %p21_p1, %s1452_s14, %s23_s19  }
   0x9   : > { %p32_p5 = por %p31_p2, %p30_p0  ;;  %p1520_p6 = por %p102_p3, %p30_p0 }
   0xa   : > { %p108_p7 = scmp.eq.s32.totalorder %s1044_s17, 1  ;;  %p1046_p9 = scmp.ge.s32.totalorder %s1456_s15, 2 }
   0xc   : > { %p1524_p8 = por %p108_p7, %p107_p4  ;;  %130 = sbr.rel (%p1046_p9) target bundleno = 63 (0x3f), region = 24 }
  0x11   : > { %133 = sbr.rel (!%p32_p5) target bundleno = 63 (0x3f), region = 28  ;;  %s135_s24 = sand.u32 (%p32_p5), 1, %s1452_s14  }
  0x12   : > { %s1285_s25 = sshll.u32 (%p32_p5), %s1456_s15, 3  ;;  %s1346_s26 = smul.u32 (%p32_p5), 336, %s135_s24 }
  0x13   : > { %s1536_s29 = scalar_lea.vmem (%p32_p5), %s1847_s0, %s1285_s25 }
  0x14   : > { %v251_v0 = vld [vmem:[%s1536_s29] sm:$0xff] (%p32_p5)  ;;  %v253_v1 = vld [vmem:[%s1536_s29 + $0x10] sm:$0xff] (%p32_p5)  ;;  %s1541_s30 = scalar_lea.vmem (%p32_p5), [#allocation2], %s1346_s26 }
  0x15   : > { %v255_v2 = vld [vmem:[%s1536_s29 + $0x20] sm:$0xff] (%p32_p5)  ;;  %252 = vst [vmem:[%s1541_s30] sm:$0xff] (%p32_p5), %v251_v0  ;;  %v257_v3 = vld [vmem:[%s1536_s29 + $0x30] sm:$0xff] (%p32_p5) }
  0x16   : > { %254 = vst [vmem:[%s1541_s30 + $0x8] sm:$0xff] %v253_v1  ;;  %v259_v4 = vld [vmem:[%s1536_s29 + $0x40] sm:$0xff]  ;;  %v261_v5 = vld [vmem:[%s1536_s29 + $0x50] sm:$0xff] }
  0x17   : > { %256 = vst [vmem:[%s1541_s30 + $0x10] sm:$0xff] %v255_v2  ;;  %v263_v6 = vld [vmem:[%s1536_s29 + $0x60] sm:$0xff]  ;;  %v265_v7 = vld [vmem:[%s1536_s29 + $0x70] sm:$0xff] }
  0x18   : > { %258 = vst [vmem:[%s1541_s30 + $0x18] sm:$0xff] %v257_v3  ;;  %v267_v8 = vld [vmem:[%s1536_s29 + $0x80] sm:$0xff]  ;;  %v269_v9 = vld [vmem:[%s1536_s29 + $0x90] sm:$0xff] }
  0x19   : > { %260 = vst [vmem:[%s1541_s30 + $0x20] sm:$0xff] %v259_v4  ;;  %v271_v10 = vld [vmem:[%s1536_s29 + $0xa0] sm:$0xff]  ;;  %v273_v11 = vld [vmem:[%s1536_s29 + $0xb0] sm:$0xff] }
  0x1a   : > { %262 = vst [vmem:[%s1541_s30 + $0x28] sm:$0xff] %v261_v5  ;;  %v275_v12 = vld [vmem:[%s1536_s29 + $0xc0] sm:$0xff]  ;;  %v277_v13 = vld [vmem:[%s1536_s29 + $0xd0] sm:$0xff] }
  0x1b   : > { %264 = vst [vmem:[%s1541_s30 + $0x30] sm:$0xff] %v263_v6  ;;  %v279_v14 = vld [vmem:[%s1536_s29 + $0xe0] sm:$0xff]  ;;  %v281_v15 = vld [vmem:[%s1536_s29 + $0xf0] sm:$0xff] }
  0x1c   : > { %266 = vst [vmem:[%s1541_s30 + $0x38] sm:$0xff] %v265_v7  ;;  %v283_v16 = vld [vmem:[%s1536_s29 + $0x100] sm:$0xff]  ;;  %v285_v17 = vld [vmem:[%s1536_s29 + $0x110] sm:$0xff] }
  0x1d   : > { %268 = vst [vmem:[%s1541_s30 + $0x40] sm:$0xff] %v267_v8  ;;  %v287_v18 = vld [vmem:[%s1536_s29 + $0x120] sm:$0xff]  ;;  %v289_v19 = vld [vmem:[%s1536_s29 + $0x130] sm:$0xff] }
  0x1e   : > { %270 = vst [vmem:[%s1541_s30 + $0x48] sm:$0xff] %v269_v9  ;;  %v291_v20 = vld [vmem:[%s1536_s29 + $0x140] sm:$0xff]  ;;  %v293_v21 = vld [vmem:[%s1536_s29 + $0x150] sm:$0xff] }
  0x1f   : > { %272 = vst [vmem:[%s1541_s30 + $0x50] sm:$0xff] %v271_v10  ;;  %v295_v22 = vld [vmem:[%s1536_s29 + $0x160] sm:$0xff]  ;;  %v297_v23 = vld [vmem:[%s1536_s29 + $0x170] sm:$0xff] }
  0x20   : > { %274 = vst [vmem:[%s1541_s30 + $0x58] sm:$0xff] %v273_v11  ;;  %v299_v24 = vld [vmem:[%s1536_s29 + $0x180] sm:$0xff]  ;;  %v301_v25 = vld [vmem:[%s1536_s29 + $0x190] sm:$0xff] }
  0x21   : > { %276 = vst [vmem:[%s1541_s30 + $0x60] sm:$0xff] %v275_v12  ;;  %v303_v26 = vld [vmem:[%s1536_s29 + $0x1a0] sm:$0xff]  ;;  %v305_v27 = vld [vmem:[%s1536_s29 + $0x1b0] sm:$0xff] }
  0x22   : > { %278 = vst [vmem:[%s1541_s30 + $0x68] sm:$0xff] %v277_v13  ;;  %v307_v28 = vld [vmem:[%s1536_s29 + $0x1c0] sm:$0xff]  ;;  %v309_v29 = vld [vmem:[%s1536_s29 + $0x1d0] sm:$0xff] }
  0x23   : > { %280 = vst [vmem:[%s1541_s30 + $0x70] sm:$0xff] %v279_v14  ;;  %v311_v30 = vld [vmem:[%s1536_s29 + $0x1e0] sm:$0xff]  ;;  %v313_v31 = vld [vmem:[%s1536_s29 + $0x1f0] sm:$0xff] }
  0x24   : > { %282 = vst [vmem:[%s1541_s30 + $0x78] sm:$0xff] %v281_v15  ;;  %v315_v32 = vld [vmem:[%s1536_s29 + $0x200] sm:$0xff]  ;;  %v317_v33 = vld [vmem:[%s1536_s29 + $0x210] sm:$0xff] }
  0x25   : > { %284 = vst [vmem:[%s1541_s30 + $0x80] sm:$0xff] %v283_v16  ;;  %v319_v34 = vld [vmem:[%s1536_s29 + $0x220] sm:$0xff]  ;;  %v321_v35 = vld [vmem:[%s1536_s29 + $0x230] sm:$0xff] }
  0x26   : > { %286 = vst [vmem:[%s1541_s30 + $0x88] sm:$0xff] %v285_v17  ;;  %v323_v36 = vld [vmem:[%s1536_s29 + $0x240] sm:$0xff]  ;;  %v325_v37 = vld [vmem:[%s1536_s29 + $0x250] sm:$0xff] }
  0x27   : > { %288 = vst [vmem:[%s1541_s30 + $0x90] sm:$0xff] %v287_v18  ;;  %v327_v38 = vld [vmem:[%s1536_s29 + $0x260] sm:$0xff]  ;;  %v329_v39 = vld [vmem:[%s1536_s29 + $0x270] sm:$0xff] }
  0x28   : > { %290 = vst [vmem:[%s1541_s30 + $0x98] sm:$0xff] %v289_v19  ;;  %v331_v40 = vld [vmem:[%s1536_s29 + $0x280] sm:$0xff]  ;;  %v333_v41 = vld [vmem:[%s1536_s29 + $0x290] sm:$0xff] }
  0x29   : > { %292 = vst [vmem:[%s1541_s30 + $0xa0] sm:$0xff] %v291_v20 }
  0x2a   : > { %294 = vst [vmem:[%s1541_s30 + $0xa8] sm:$0xff] %v293_v21 }
  0x2b   : > { %296 = vst [vmem:[%s1541_s30 + $0xb0] sm:$0xff] %v295_v22 }
  0x2c   : > { %298 = vst [vmem:[%s1541_s30 + $0xb8] sm:$0xff] %v297_v23 }
  0x2d   : > { %300 = vst [vmem:[%s1541_s30 + $0xc0] sm:$0xff] %v299_v24 }
  0x2e   : > { %302 = vst [vmem:[%s1541_s30 + $0xc8] sm:$0xff] %v301_v25 }
  0x2f   : > { %304 = vst [vmem:[%s1541_s30 + $0xd0] sm:$0xff] %v303_v26 }
  0x30   : > { %306 = vst [vmem:[%s1541_s30 + $0xd8] sm:$0xff] %v305_v27 }
  0x31   : > { %308 = vst [vmem:[%s1541_s30 + $0xe0] sm:$0xff] %v307_v28 }
  0x32   : > { %310 = vst [vmem:[%s1541_s30 + $0xe8] sm:$0xff] %v309_v29 }
  0x33   : > { %312 = vst [vmem:[%s1541_s30 + $0xf0] sm:$0xff] %v311_v30 }
  0x34   : > { %314 = vst [vmem:[%s1541_s30 + $0xf8] sm:$0xff] %v313_v31 }
  0x35   : > { %316 = vst [vmem:[%s1541_s30 + $0x100] sm:$0xff] %v315_v32 }
  0x36   : > { %318 = vst [vmem:[%s1541_s30 + $0x108] sm:$0xff] %v317_v33 }
  0x37   : > { %320 = vst [vmem:[%s1541_s30 + $0x110] sm:$0xff] %v319_v34 }
  0x38   : > { %322 = vst [vmem:[%s1541_s30 + $0x118] sm:$0xff] %v321_v35 }
  0x39   : > { %324 = vst [vmem:[%s1541_s30 + $0x120] sm:$0xff] %v323_v36 }
  0x3a   : > { %326 = vst [vmem:[%s1541_s30 + $0x128] sm:$0xff] %v325_v37 }
  0x3b   : > { %328 = vst [vmem:[%s1541_s30 + $0x130] sm:$0xff] %v327_v38 }
  0x3c   : > { %330 = vst [vmem:[%s1541_s30 + $0x138] sm:$0xff] %v329_v39 }
  0x3d   : > { %332 = vst [vmem:[%s1541_s30 + $0x140] sm:$0xff] %v331_v40 }
  0x3e   : > { %334 = vst [vmem:[%s1541_s30 + $0x148] sm:$0xff] %v333_v41 }
  0x3f PF: > { %p1049_p10 = scmp.ge.s32.totalorder %s1456_s15, 1  ;;  %p339_p11 = scmp.lt.s32.totalorder %s1456_s15, 3 }
  0x41   : > { %p340_p12 = pnand %p1049_p10, %p339_p11 }
  0x42   : > { %s1627_s4 = sand.u32 (!%p340_p12), 1, %s1448_s13   ;;  %s1334_s25 = sshll.u32 (!%p340_p12), %s1043_s16, 4 }
  0x43   : > { %343 = sbr.rel (%p340_p12) target bundleno = 304 (0x130), region = 66  ;;  %s972_s28 = scalar_lea.hbm (!%p340_p12), %s1850_s3, %s1334_s25 }
  0x44   : > { %s1347_s5 = smul.u32 (!%p340_p12), 336, %s1627_s4  ;;  %s1814_s30 = sshll.u32 (!%p340_p12), %s972_s28, 4  ;;  %s976_s30 = int_to_ptr.hbm [resolvable:$true] %s1814_s30 }
  0x45   : > { %s961_s16 = scalar_lea.sflag (!%p340_p12), [#allocation4], %s1627_s4  ;;  %s1414_s10 = scalar_lea.hbm (!%p340_p12), %s1850_s3, 256 }
  0x46   : > { %s1630_s6 = scalar_lea.vmem (!%p340_p12), [#allocation2], %s1347_s5  ;;  %s1408_s5 = sshra.s32 (!%p340_p12), %s976_s30, 4  ;;  %s1409_s5 = int_to_ptr.hbm [resolvable:$true] %s1408_s5 }
  0x47   : > { %s1410_s7 = scalar_lea.hbm (!%p340_p12), %s1409_s5, 128  ;;  %p1415_p2 = scmp.lt.s32.totalorder (!%p340_p12), %s1409_s5, %s1850_s3 }
  0x48   : > { %v1125_v42 = vld [vmem:[%s1630_s6 + $0x70] sm:$0xf]  ;;  %v1301_v43 = vld [vmem:[%s1630_s6 + $0x74] sm:$0xf0]  ;;  %v1300_v44 = vld [vmem:[%s1630_s6 + $0x74] sm:$0xf]  ;;  %p1411_p13 = scmp.ne.s32.totalorder %s1409_s5, %s1410_s7  ;;  %p1416_p3 = scmp.lt.s32.totalorder %s1414_s10, %s1410_s7 }
  0x49   : > { %v1126_v45 = vor.u32 %v1301_v43, %v1125_v42  ;;  %v1127_v46 = vld [vmem:[%s1630_s6 + $0x78] sm:$0xf0]  ;;  %v392_v47 = vld [vmem:[%s1630_s6 + $0xa0] sm:$0x11]  ;;  %v1299_v52 = vld [vmem:[%s1630_s6 + $0x64] sm:$0xf0] }
  0x4a   : > { %v1117_v48 = vld [vmem:[%s1630_s6 + $0x60] sm:$0xf]  ;;  %v1130_v49 = vor.u32 %v1300_v44, %v1127_v46  ;;  %v500_v50 = vunpack.c.l.b16 %v392_v47  ;;  %v501_v51 = vunpack.c.h.b16 %v392_v47  ;;  %v1298_v53 = vld [vmem:[%s1630_s6 + $0x64] sm:$0xf]  ;;  %v1119_v54 = vld [vmem:[%s1630_s6 + $0x68] sm:$0xf0]  ;;  %p1412_p0 = pnand %p1411_p13, %p1520_p6  ;;  %p1417_p4 = por %p1416_p3, %p1415_p2 }
  0x4b   : > { %558 = vmatpush.bf16.msra.mxu0 %v1126_v45  ;;  %vm551_vm0 = vcmask 1040384   ;;  %v1141_v55 = vld [vmem:[%s1630_s6 + $0x90] sm:$0xf]  ;;  %v1305_v56 = vld [vmem:[%s1630_s6 + $0x94] sm:$0xf0]  ;;  %v1118_v59 = vor.u32 %v1299_v52, %v1117_v48  ;;  %v1122_v60 = vor.u32 %v1298_v53, %v1119_v54  ;;  %v1458_v37 = vmov 0  }
  0x4c   : > { %596 = vmatpush.bf16.msra.mxu2 %v1130_v49  ;;  %v522_v57 = vpack.c.b16 %v500_v50, %v500_v50  ;;  %v523_v58 = vpack.c.b16 %v501_v51, %v501_v51  ;;  %v1304_v61 = vld [vmem:[%s1630_s6 + $0x94] sm:$0xf]  ;;  %v1143_v62 = vld [vmem:[%s1630_s6 + $0x98] sm:$0xf0]  ;;  %v1109_v63 = vld [vmem:[%s1630_s6 + $0x50] sm:$0xf]  ;;  %v1142_v5 = vor.u32 %v1305_v56, %v1141_v55  ;;  %1391 = vset.pattern.permute.xlu0 %v1458_v37  ;;  %p1413_p1 = pneg %p1412_p0 }
  0x4d   : > { %v1297_v0 = vld [vmem:[%s1630_s6 + $0x54] sm:$0xf0]  ;;  %v1296_v1 = vld [vmem:[%s1630_s6 + $0x54] sm:$0xf]  ;;  %v1111_v2 = vld [vmem:[%s1630_s6 + $0x58] sm:$0xf0]  ;;  %v1146_v6 = vor.u32 %v1304_v61, %v1143_v62  ;;  %1392 = vset.pattern.permute.xlu1 %v1458_v37  ;;  %1393 = vset.pattern.permute.xlu2 %v1458_v37 }
  0x4e   : > { %v553_v3 = vsel %vm551_vm0, %v522_v57, 0  ;;  %v556_v4 = vsel %vm551_vm0, %v523_v58, 0  ;;  %v1133_v7 = vld [vmem:[%s1630_s6 + $0x80] sm:$0xf]  ;;  %v1303_v8 = vld [vmem:[%s1630_s6 + $0x84] sm:$0xf0]  ;;  %v1110_v10 = vor.u32 %v1297_v0, %v1109_v63  ;;  %v1114_v11 = vor.u32 %v1296_v1, %v1111_v2  ;;  %p1418_p5 = pnand %p1417_p4, %p1413_p1 }
  0x4f   : > { %582 = vmatpush.bf16.msra.mxu1 %v553_v3  ;;  %620 = vmatpush.bf16.msra.mxu3 %v556_v4  ;;  %v1302_v9 = vld [vmem:[%s1630_s6 + $0x84] sm:$0xf]  ;;  %v1135_v12 = vld [vmem:[%s1630_s6 + $0x88] sm:$0xf0]  ;;  %v1101_v13 = vld [vmem:[%s1630_s6 + $0x40] sm:$0xf]  ;;  %v1134_v21 = vor.u32 %v1303_v8, %v1133_v7 }
  0x50   : > { %559 = vmatpush.bf16.msra.mxu0 %v1118_v59  ;;  %597 = vmatpush.bf16.msra.mxu2 %v1122_v60  ;;  %v1657_v14 = vld [vmem:[%s1630_s6 + $0x148] sm:$0x11]  ;;  %v1294_v16 = vld [vmem:[%s1630_s6 + $0x44] sm:$0xf]  ;;  %v1246_v19 = vld [vmem:[%s1630_s6 + $0x118] sm:$0xf]  ;;  %v1138_v22 = vor.u32 %v1302_v9, %v1135_v12 }
  0x51   : > { %v1295_v15 = vld [vmem:[%s1630_s6 + $0x44] sm:$0xf0]  ;;  %v1103_v17 = vld [vmem:[%s1630_s6 + $0x48] sm:$0xf0]  ;;  %v795_v18 = vunpack.c.l.b16 %v1657_v14  ;;  %v1325_v20 = vld [vmem:[%s1630_s6 + $0x11c] sm:$0xf0]  ;;  %v796_v50 = vunpack.c.h.b16 %v1657_v14 }
  0x52   : > { %v1306_v23 = vld [vmem:[%s1848_s1 + $0x4] sm:$0xf]  ;;  %v1055_v24 = vld [vmem:[%s1848_s1 + $0x8] sm:$0xf0]  ;;  %v1102_v26 = vor.u32 %v1295_v15, %v1101_v13  ;;  %v1106_v27 = vor.u32 %v1294_v16, %v1103_v17  ;;  %v1093_v28 = vld [vmem:[%s1630_s6 + $0x30] sm:$0xf]  ;;  %v1247_v30 = vor.u32 %v1325_v20, %v1246_v19 }
  0x53   : > { %583 = vmatpush.bf16.msra.mxu1 %v1142_v5  ;;  %621 = vmatpush.bf16.msra.mxu3 %v1146_v6  ;;  %v817_v25 = vpack.c.b16 %v795_v18, %v795_v18  ;;  %v1293_v29 = vld [vmem:[%s1630_s6 + $0x34] sm:$0xf0]  ;;  %v1292_v31 = vld [vmem:[%s1630_s6 + $0x34] sm:$0xf]  ;;  %v1095_v32 = vld [vmem:[%s1630_s6 + $0x38] sm:$0xf0]  ;;  %v1058_v33 = vor.u32 %v1306_v23, %v1055_v24  ;;  %v818_v61 = vpack.c.b16 %v796_v50, %v796_v50 }
  0x54   : > { %560 = vmatpush.bf16.msra.mxu0 %v1110_v10  ;;  %598 = vmatpush.bf16.msra.mxu2 %v1114_v11  ;;  %v1238_v35 = vld [vmem:[%s1630_s6 + $0x108] sm:$0xf]  ;;  %v1323_v36 = vld [vmem:[%s1630_s6 + $0x10c] sm:$0xf0]  ;;  %vm544_vm1 = vcmask 277504   ;;  %v1094_v40 = vor.u32 %v1293_v29, %v1093_v28  ;;  %v1098_v41 = vor.u32 %v1292_v31, %v1095_v32 }
  0x55   : > { %v846_v34 = vsel %vm551_vm0, %v817_v25, 0  ;;  %v1262_v38 = vld [vmem:[%s1630_s6 + $0x138] sm:$0xf]  ;;  %v1329_v39 = vld [vmem:[%s1630_s6 + $0x13c] sm:$0xf0]  ;;  %v1239_v43 = vor.u32 %v1323_v36, %v1238_v35  ;;  %v849_v11 = vsel %vm551_vm0, %v818_v61, 0 }
  0x56   : > { %v1085_v42 = vld [vmem:[%s1630_s6 + $0x20] sm:$0xf]  ;;  %v1291_v44 = vld [vmem:[%s1630_s6 + $0x24] sm:$0xf0]  ;;  %v1290_v45 = vld [vmem:[%s1630_s6 + $0x24] sm:$0xf]  ;;  %v1263_v47 = vor.u32 %v1329_v39, %v1262_v38 }
  0x57   : > { %584 = vmatpush.bf16.msra.mxu1 %v1134_v21  ;;  %622 = vmatpush.bf16.msra.mxu3 %v1138_v22  ;;  %v1087_v46 = vld [vmem:[%s1630_s6 + $0x28] sm:$0xf0]  ;;  %v1230_v48 = vld [vmem:[%s1630_s6 + $0xf8] sm:$0xf]  ;;  %v1321_v49 = vld [vmem:[%s1630_s6 + $0xfc] sm:$0xf0]  ;;  %v1086_v51 = vor.u32 %v1291_v44, %v1085_v42 }
  0x58   : > { %561 = vmatpush.bf16.msra.mxu0 %v1102_v26  ;;  %599 = vmatpush.bf16.msra.mxu2 %v1106_v27  ;;  %v1090_v52 = vor.u32 %v1290_v45, %v1087_v46  ;;  %v1077_v53 = vld [vmem:[%s1630_s6 + $0x10] sm:$0xf]  ;;  %v1254_v54 = vld [vmem:[%s1630_s6 + $0x128] sm:$0xf]  ;;  %v1231_v56 = vor.u32 %v1321_v49, %v1230_v48  ;;  %v1289_v57 = vld [vmem:[%s1630_s6 + $0x14] sm:$0xf0] }
  0x59   : > { %v1327_v55 = vld [vmem:[%s1630_s6 + $0x12c] sm:$0xf0]  ;;  %v1288_v58 = vld [vmem:[%s1630_s6 + $0x14] sm:$0xf]  ;;  %v1079_v59 = vld [vmem:[%s1630_s6 + $0x18] sm:$0xf0]  ;;  %v1078_v1 = vor.u32 %v1289_v57, %v1077_v53 }
  0x5a   : > { %1147 = vmatmul.msk.bf16.vlgmr.msra.gmra.mxu1 %vm544_vm1, %v1058_v33  ;;  %1149 = vmatmul.msk.bf16.vlgmr.msra.gmra.mxu3 %vm544_vm1, %v1058_v33  ;;  %v1255_v60 = vor.u32 %v1327_v55, %v1254_v54  ;;  %v1222_v62 = vld [vmem:[%s1630_s6 + $0xe8] sm:$0xf]  ;;  %v1319_v63 = vld [vmem:[%s1630_s6 + $0xec] sm:$0xf0]  ;;  %v1082_v2 = vor.u32 %v1288_v58, %v1079_v59  ;;  %v1069_v3 = vld [vmem:[%s1630_s6] sm:$0xf] }
  0x5b   : > { %875 = vmatpush.bf16.msrb.mxu3 %v846_v34  ;;  %851 = vmatpush.bf16.msrb.mxu1 %v1247_v30  ;;  %v397_v0 = vld [vmem:[%s1849_s2] sm:$0xff]  ;;  %v1287_v4 = vld [vmem:[%s1630_s6 + $0x4] sm:$0xf0]  ;;  %v1223_v6 = vor.u32 %v1319_v63, %v1222_v62  ;;  %v1071_v7 = vld [vmem:[%s1630_s6 + $0x8] sm:$0xf0] }
  0x5c   : > { %562 = vmatpush.bf16.msra.mxu0 %v1094_v40  ;;  %600 = vmatpush.bf16.msra.mxu2 %v1098_v41  ;;  %v1286_v5 = vld [vmem:[%s1630_s6 + $0x4] sm:$0xf]  ;;  %v1063_v9 = vld [vmem:[%s1848_s1 + $0x18] sm:$0xf0]  ;;  %v1214_v10 = vld [vmem:[%s1630_s6 + $0xd8] sm:$0xf]  ;;  %v1070_v18 = vor.u32 %v1287_v4, %v1069_v3 }
  0x5d   : > { %403 = vperm.xlu0 %1391, %v397_v0   ;;  %698 = vperm.xlu2 %1393, %v397_v0   ;;  %v1308_v8 = vld [vmem:[%s1848_s1 + $0x14] sm:$0xf]  ;;  %v1317_v12 = vld [vmem:[%s1630_s6 + $0xdc] sm:$0xf0]  ;;  %v1324_v13 = vld [vmem:[%s1630_s6 + $0x11c] sm:$0xf]  ;;  %v1074_v19 = vor.u32 %v1286_v5, %v1071_v7 }
  0x5e   : > { %v1248_v14 = vld [vmem:[%s1630_s6 + $0x120] sm:$0xf0]  ;;  %v1053_v15 = vld [vmem:[%s1848_s1] sm:$0xf]  ;;  %v1307_v16 = vld [vmem:[%s1848_s1 + $0x4] sm:$0xf0]  ;;  %v1215_v23 = vor.u32 %v1317_v12, %v1214_v10  ;;  %v1066_v27 = vor.u32 %v1308_v8, %v1063_v9 }
  0x5f   : > { %852 = vmatpush.bf16.msrb.mxu1 %v1239_v43  ;;  %876 = vmatpush.bf16.msrb.mxu3 %v1263_v47  ;;  %v398_v17 = vld [vmem:[%s1849_s2 + $0x8] sm:$0xff]  ;;  %v1264_v21 = vld [vmem:[%s1630_s6 + $0x140] sm:$0xf0]  ;;  %v1251_v25 = vor.u32 %v1324_v13, %v1248_v14  ;;  %v1315_v28 = vld [vmem:[%s1630_s6 + $0xcc] sm:$0xf0]  ;;  %v1054_v31 = vor.u32 %v1307_v16, %v1053_v15 }
  0x60   : > { %563 = vmatpush.bf16.msra.mxu0 %v1086_v51  ;;  %601 = vmatpush.bf16.msra.mxu2 %v1090_v52  ;;  %v1328_v20 = vld [vmem:[%s1630_s6 + $0x13c] sm:$0xf]  ;;  %v399_v22 = vld [vmem:[%s1849_s2 + $0x10] sm:$0xff]  ;;  %v1206_v24 = vld [vmem:[%s1630_s6 + $0xc8] sm:$0xf] }
  0x61   : > { %v1267_v26 = vor.u32 %v1328_v20, %v1264_v21  ;;  %413 = vperm.xlu1 %1392, %v399_v22   ;;  %v1322_v29 = vld [vmem:[%s1630_s6 + $0x10c] sm:$0xf]  ;;  %v1240_v30 = vld [vmem:[%s1630_s6 + $0x110] sm:$0xf0]  ;;  %v1207_v32 = vor.u32 %v1315_v28, %v1206_v24  ;;  %v1198_v33 = vld [vmem:[%s1630_s6 + $0xb8] sm:$0xf] }
  0x62   : > { %v1313_v34 = vld [vmem:[%s1630_s6 + $0xbc] sm:$0xf0]  ;;  %v1243_v35 = vor.u32 %v1322_v29, %v1240_v30  ;;  %v1320_v36 = vld [vmem:[%s1630_s6 + $0xfc] sm:$0xf]  ;;  %v1232_v37 = vld [vmem:[%s1630_s6 + $0x100] sm:$0xf0] }
  0x63   : > { %853 = vmatpush.bf16.msrb.mxu1 %v1231_v56  ;;  %877 = vmatpush.bf16.msrb.mxu3 %v1255_v60  ;;  %v1326_v38 = vld [vmem:[%s1630_s6 + $0x12c] sm:$0xf]  ;;  %v1256_v39 = vld [vmem:[%s1630_s6 + $0x130] sm:$0xf0]  ;;  %v1199_v42 = vor.u32 %v1313_v34, %v1198_v33  ;;  %v1190_v43 = vld [vmem:[%s1630_s6 + $0xa8] sm:$0xf]  ;;  %v1235_v44 = vor.u32 %v1320_v36, %v1232_v37 }
  0x64   : > { %564 = vmatpush.bf16.msra.mxu0 %v1078_v1  ;;  %602 = vmatpush.bf16.msra.mxu2 %v1082_v2  ;;  %v400_v40 = vld [vmem:[%s1849_s2 + $0x18] sm:$0xff]  ;;  %v1259_v41 = vor.u32 %v1326_v38, %v1256_v39  ;;  %v1311_v45 = vld [vmem:[%s1630_s6 + $0xac] sm:$0xf0]  ;;  %v1224_v47 = vld [vmem:[%s1630_s6 + $0xf0] sm:$0xf0] }
  0x65   : > { %408 = vperm.xlu0 %1391, %v398_v17   ;;  %703 = vperm.xlu2 %1393, %v398_v17   ;;  %v1318_v46 = vld [vmem:[%s1630_s6 + $0xec] sm:$0xf]  ;;  %v1191_v48 = vor.u32 %v1311_v45, %v1190_v43  ;;  %v1174_v50 = vld [vmem:[%s1848_s1] sm:$0xf]  ;;  %v1316_v51 = vld [vmem:[%s1630_s6 + $0xdc] sm:$0xf] }
  0x66   : > { %v1227_v49 = vor.u32 %v1318_v46, %v1224_v47  ;;  %v1216_v52 = vld [vmem:[%s1630_s6 + $0xe0] sm:$0xf0]  ;;  %v1331_v53 = vld [vmem:[%s1848_s1 + $0x4] sm:$0xf0]  ;;  %v1176_v55 = vld [vmem:[%s1848_s1 + $0x8] sm:$0xf0] }
  0x67   : > { %1343 = vmatpush.bf16.msra.mxu3 %v849_v11  ;;  %854 = vmatpush.bf16.msrb.mxu1 %v1223_v6  ;;  %v1330_v54 = vld [vmem:[%s1848_s1 + $0x4] sm:$0xf]  ;;  %v1061_v56 = vld [vmem:[%s1848_s1 + $0x10] sm:$0xf]  ;;  %v1309_v57 = vld [vmem:[%s1848_s1 + $0x14] sm:$0xf0]  ;;  %v1219_v58 = vor.u32 %v1316_v51, %v1216_v52  ;;  %v1175_v59 = vor.u32 %v1331_v53, %v1174_v50 }
  0x68   : > { %565 = vmatpush.bf16.msra.mxu0 %v1070_v18  ;;  %603 = vmatpush.bf16.msra.mxu2 %v1074_v19  ;;  %v1179_v60 = vor.u32 %v1330_v54, %v1176_v55  ;;  %v1314_v61 = vld [vmem:[%s1630_s6 + $0xcc] sm:$0xf]  ;;  %v1208_v62 = vld [vmem:[%s1630_s6 + $0xd0] sm:$0xf0]  ;;  %v1062_v63 = vor.u32 %v1309_v57, %v1061_v56  ;;  %v1312_v1 = vld [vmem:[%s1630_s6 + $0xbc] sm:$0xf] }
  0x69   : > { %418 = vperm.xlu1 %1392, %v400_v40   ;;  %v1211_v0 = vor.u32 %v1314_v61, %v1208_v62  ;;  %v1200_v2 = vld [vmem:[%s1630_s6 + $0xc0] sm:$0xf0]  ;;  %v1310_v4 = vld [vmem:[%s1630_s6 + $0xac] sm:$0xf]  ;;  %v1192_v5 = vld [vmem:[%s1630_s6 + $0xb0] sm:$0xf0] }
  0x6a   : > { %1148 = vmatmul.msk.bf16.gmra.mxu1 %vm544_vm1, %v1066_v27  ;;  %1150 = vmatmul.msk.bf16.gmra.mxu3 %vm544_vm1, %v1066_v27  ;;  %v1203_v3 = vor.u32 %v1312_v1, %v1200_v2  ;;  %v1195_v6 = vor.u32 %v1310_v4, %v1192_v5  ;;  %v1182_v7 = vld [vmem:[%s1848_s1 + $0x10] sm:$0xf]  ;;  %v1333_v8 = vld [vmem:[%s1848_s1 + $0x14] sm:$0xf0]  ;;  %v1332_v9 = vld [vmem:[%s1848_s1 + $0x14] sm:$0xf] }
  0x6b   : > { %1344 = vmatpush.bf16.msra.mxu3 %v1267_v26  ;;  %855 = vmatpush.bf16.msrb.mxu1 %v1215_v23  ;;  %v1184_v10 = vld [vmem:[%s1848_s1 + $0x18] sm:$0xf0]  ;;  %s1050_s6 = sshll.u32 %s1627_s4, 7 }
  0x6c   : > { %889 = vmatpush.bf16.msrb.mxu0 %v1251_v25  ;;  %604 = vmatmul.bf16.vlgmr.msra.gmra.mxu2 %v1054_v31  ;;  %v1187_v12 = vor.u32 %v1332_v9, %v1184_v10  ;;  %s1791_s24 = scalar_lea.vmem [#allocation3], %s1050_s6 }
  0x6d   : > { %566 = vmatmul.bf16.vlgmr.msra.gmra.mxu0 %v1054_v31  ;;  %913 = vmatpush.bf16.msrb.mxu2 %v849_v11  ;;  %v1183_v11 = vor.u32 %v1333_v8, %v1182_v7  ;;  %s973_s29 = sshll.u32 %s1791_s24, 4  ;;  %s974_s29 = int_to_ptr.vmem [resolvable:$true] %s973_s29 }
  0x6e   : > { %708 = vperm.xlu0 %1391, %v399_v22  }
  0x6f   : > { %856 = vmatpush.bf16.msrb.mxu1 %v1207_v32  ;;  %1345 = vmatpush.bf16.msra.mxu3 %v1259_v41 }
  0x70   : > { %890 = vmatpush.bf16.msrb.mxu0 %v1243_v35 }
  0x71   : > { %914 = vmatpush.bf16.msrb.mxu2 %v1267_v26  ;;  %713 = vperm.xlu1 %1392, %v400_v40  }
  0x73   : > { %857 = vmatpush.bf16.msrb.mxu1 %v1199_v42 }
  0x74   : > { %891 = vmatpush.bf16.msrb.mxu0 %v1235_v44 }
  0x75   : > { %915 = vmatpush.bf16.msrb.mxu2 %v1259_v41 }
  0x77   : > { %858 = vmatpush.bf16.msrb.mxu1 %v1191_v48 }
  0x78   : > { %892 = vmatpush.bf16.msrb.mxu0 %v1227_v49 }
  0x7a   : > { %859 = vmatmul.bf16.vlgmr.msrb.gmra.mxu1 %v1175_v59  ;;  %1268 = vmatmul.msk.bf16.vlgmr.msrb.gmra.mxu3 %vm544_vm1, %v1179_v60 }
  0x7b   : > { %1335 = vmatpush.bf16.msra.mxu1 %v1251_v25 }
  0x7c   : > { %893 = vmatpush.bf16.msrb.mxu0 %v1219_v58  ;;  %609 = vmatmul.bf16.gmra.mxu2 %v1062_v63 }
  0x7d   : > { %571 = vmatmul.bf16.gmra.mxu0 %v1062_v63 }
  0x7f   : > { %1336 = vmatpush.bf16.msra.mxu1 %v1243_v35 }
  0x80   : > { %894 = vmatpush.bf16.msrb.mxu0 %v1211_v0 }
  0x83   : > { %1337 = vmatpush.bf16.msra.mxu1 %v1235_v44 }
  0x84   : > { %895 = vmatpush.bf16.msrb.mxu0 %v1203_v3 }
  0x87   : > { %1338 = vmatpush.bf16.msra.mxu1 %v1227_v49 }
  0x88   : > { %896 = vmatpush.bf16.msrb.mxu0 %v1195_v6 }
  0x8a   : > { %864 = vmatmul.bf16.gmra.mxu1 %v1183_v11  ;;  %1269 = vmatmul.msk.bf16.gmra.mxu3 %vm544_vm1, %v1187_v12 }
  0x8b   : > { %1339 = vmatpush.bf16.msra.mxu1 %v1219_v58 }
  0x8c   : > { %1270 = vmatmul.msk.bf16.vlgmr.msrb.gmra.mxu2 %vm544_vm1, %v1179_v60 }
  0x8d   : > { %897 = vmatmul.bf16.vlgmr.msrb.gmra.mxu0 %v1175_v59 }
  0x8f   : > { %1340 = vmatpush.bf16.msra.mxu1 %v1211_v0 }
  0x93   : > { %1341 = vmatpush.bf16.msra.mxu1 %v1203_v3 }
  0x97   : > { %1342 = vmatpush.bf16.msra.mxu1 %v1195_v6 }
  0x9a   : > { %902 = vmatmul.bf16.vlgmr.msra.gmra.mxu1 %v1183_v11  ;;  %1271 = vmatmul.msk.bf16.vlgmr.msra.gmra.mxu3 %vm544_vm1, %v1187_v12 }
  0xb7   : > { %v699_v41 = vpop.permute.xlu2 %698 }
  0xbf   : > { %v704_v61 = vpop.permute.xlu2 %703 }
  0xcf   : > { %v404_v16 = vpop.permute.xlu0 %403 }
  0xd3   : > { %v414_v34 = vpop.permute.xlu1 %413 }
  0xd7   : > { %v586_v13 = vpop.f32.mrf.mxu1  ;;  %v409_v25 = vpop.permute.xlu0 %408 }
  0xdb   : > { %v419_v54 = vpop.permute.xlu1 %418 }
  0xdd   : > { %v624_v14 = vpop.f32.mrf.mxu3 }
  0xdf   : > { %v588_v15 = vpop.f32.mrf.mxu1 }
  0xe0   : > { %v709_v11 = vpop.permute.xlu0 %708 }
  0xe5   : > { %v626_v17 = vpop.f32.mrf.mxu3 }
  0xe7   : > { %v591_v18 = vpop.f32.mrf.mxu1 }
  0xea   : > { %v567_v19 = vpop.f32.mrf.mxu0 }
  0xeb   : > { %v568_v20 = vadd.f32 %v567_v19, %v404_v16 }
  0xed   : > { %v587_v21 = vadd.f32 %v586_v13, %v568_v20  ;;  %v629_v23 = vpop.f32.mrf.mxu3 }
  0xef   : > { %vm634_vm2 = vcmp.gt.f32.partialorder %v587_v21, 0.0  ;;  %v642_v22 = vmul.f32 0.1, %v587_v21  ;;  %v605_v24 = vpop.f32.mrf.mxu2  ;;  %v593_v28 = vpop.f32.mrf.mxu1 }
  0xf0   : > { %v606_v27 = vadd.f32 %v605_v24, %v404_v16 }
  0xf1   : > { %v650_v26 = vsel %vm634_vm2, %v587_v21, %v642_v22 }
  0xf2   : > { %658 = vst [vmem:[%s1791_s24] sm:$0xff] %v650_v26  ;;  %v569_v29 = vpop.f32.mrf.mxu0  ;;  %v625_v30 = vadd.f32 %v624_v14, %v606_v27  ;;  %v714_v27 = vpop.permute.xlu1 %713 }
  0xf3   : > { %v570_v31 = vadd.f32 %v569_v29, %v409_v25 }
  0xf4   : > { %vm635_vm3 = vcmp.gt.f32.partialorder %v625_v30, 0.0  ;;  %v643_v32 = vmul.f32 0.1, %v625_v30 }
  0xf5   : > { %v589_v33 = vadd.f32 %v588_v15, %v570_v31  ;;  %v631_v37 = vpop.f32.mrf.mxu3 }
  0xf6   : > { %v651_v35 = vsel %vm635_vm3, %v625_v30, %v643_v32 }
  0xf7   : > { %vm636_vm4 = vcmp.gt.f32.partialorder %v589_v33, 0.0  ;;  %v644_v36 = vmul.f32 0.1, %v589_v33  ;;  %659 = vst [vmem:[%s1791_s24 + $0x8] sm:$0xff] %v651_v35  ;;  %v607_v38 = vpop.f32.mrf.mxu2  ;;  %v860_v42 = vpop.f32.mrf.mxu1 }
  0xf8   : > { %v608_v40 = vadd.f32 %v607_v38, %v409_v25  ;;  %v861_v46 = vadd.f32 %v860_v42, %v699_v41 }
  0xf9   : > { %v652_v39 = vsel %vm636_vm4, %v589_v33, %v644_v36 }
  0xfa   : > { %660 = vst [vmem:[%s1791_s24 + $0x10] sm:$0xff] %v652_v39  ;;  %v572_v43 = vpop.f32.mrf.mxu0  ;;  %v627_v44 = vadd.f32 %v626_v17, %v608_v40 }
  0xfb   : > { %v573_v45 = vadd.f32 %v572_v43, %v414_v34 }
  0xfc   : > { %vm637_vm5 = vcmp.gt.f32.partialorder %v627_v44, 0.0  ;;  %v645_v47 = vmul.f32 0.1, %v627_v44 }
  0xfd   : > { %v592_v48 = vadd.f32 %v591_v18, %v573_v45  ;;  %v879_v51 = vpop.f32.mrf.mxu3 }
  0xfe   : > { %v653_v49 = vsel %vm637_vm5, %v627_v44, %v645_v47  ;;  %v880_v52 = vadd.f32 %v879_v51, %v861_v46 }
  0xff   : > { %vm638_vm6 = vcmp.gt.f32.partialorder %v592_v48, 0.0  ;;  %v646_v50 = vmul.f32 0.1, %v592_v48  ;;  %661 = vst [vmem:[%s1791_s24 + $0x18] sm:$0xff] %v653_v49  ;;  %v610_v53 = vpop.f32.mrf.mxu2  ;;  %v862_v57 = vpop.f32.mrf.mxu1 }
 0x100   : > { %v611_v56 = vadd.f32 %v610_v53, %v414_v34  ;;  %vm927_vm7 = vcmp.gt.f32.partialorder %v880_v52, 0.0  ;;  %v935_v58 = vmul.f32 0.1, %v880_v52  ;;  %v863_v2 = vadd.f32 %v862_v57, %v704_v61 }
 0x101   : > { %v654_v55 = vsel %vm638_vm6, %v592_v48, %v646_v50 }
 0x102   : > { %662 = vst [vmem:[%s1791_s24 + $0x20] sm:$0xff] %v654_v55  ;;  %v574_v59 = vpop.f32.mrf.mxu0  ;;  %v630_v60 = vadd.f32 %v629_v23, %v611_v56  ;;  %v943_v63 = vsel %vm927_vm7, %v880_v52, %v935_v58 }
 0x103   : > { %v575_v62 = vadd.f32 %v574_v59, %v419_v54  ;;  %1272 = vst [vmem:[%s1791_s24 + $0x40] sm:$0xff] %v943_v63 }
 0x104   : > { %vm639_vm8 = vcmp.gt.f32.partialorder %v630_v60, 0.0  ;;  %v647_v0 = vmul.f32 0.1, %v630_v60 }
 0x105   : > { %v594_v1 = vadd.f32 %v593_v28, %v575_v62  ;;  %v881_v5 = vpop.f32.mrf.mxu3 }
 0x106   : > { %v655_v3 = vsel %vm639_vm8, %v630_v60, %v647_v0  ;;  %v882_v6 = vadd.f32 %v881_v5, %v863_v2 }
 0x107   : > { %vm640_vm9 = vcmp.gt.f32.partialorder %v594_v1, 0.0  ;;  %v648_v4 = vmul.f32 0.1, %v594_v1  ;;  %663 = vst [vmem:[%s1791_s24 + $0x28] sm:$0xff] %v655_v3  ;;  %v612_v7 = vpop.f32.mrf.mxu2  ;;  %v865_v10 = vpop.f32.mrf.mxu1 }
 0x108   : > { %v613_v9 = vadd.f32 %v612_v7, %v419_v54  ;;  %vm929_vm10 = vcmp.gt.f32.partialorder %v882_v6, 0.0  ;;  %v937_v12 = vmul.f32 0.1, %v882_v6  ;;  %v866_v16 = vadd.f32 %v865_v10, %v709_v11 }
 0x109   : > { %v656_v8 = vsel %vm640_vm9, %v594_v1, %v648_v4 }
 0x10a   : > { %664 = vst [vmem:[%s1791_s24 + $0x30] sm:$0xff] %v656_v8  ;;  %v898_v13 = vpop.f32.mrf.mxu0  ;;  %v632_v14 = vadd.f32 %v631_v37, %v613_v9  ;;  %v945_v15 = vsel %vm929_vm10, %v882_v6, %v937_v12 }
 0x10b   : > { %1274 = vst [vmem:[%s1791_s24 + $0x50] sm:$0xff] %v945_v15  ;;  %v899_v18 = vadd.f32 %v898_v13, %v699_v41 }
 0x10c   : > { %vm641_vm11 = vcmp.gt.f32.partialorder %v632_v14, 0.0  ;;  %v649_v17 = vmul.f32 0.1, %v632_v14 }
 0x10d   : > { %v884_v20 = vpop.f32.mrf.mxu3 }
 0x10e   : > { %v657_v19 = vsel %vm641_vm11, %v632_v14, %v649_v17  ;;  %v885_v21 = vadd.f32 %v884_v20, %v866_v16 }
 0x10f   : > { %665 = vst [vmem:[%s1791_s24 + $0x38] sm:$0xff] %v657_v19  ;;  %v917_v22 = vpop.f32.mrf.mxu2  ;;  %v867_v23 = vpop.f32.mrf.mxu1 }
 0x110   : > { %v918_v24 = vadd.f32 %v917_v22, %v899_v18  ;;  %vm931_vm12 = vcmp.gt.f32.partialorder %v885_v21, 0.0  ;;  %v939_v25 = vmul.f32 0.1, %v885_v21  ;;  %v868_v32 = vadd.f32 %v867_v23, %v714_v27 }
 0x112   : > { %v900_v26 = vpop.f32.mrf.mxu0  ;;  %vm928_vm13 = vcmp.gt.f32.partialorder %v918_v24, 0.0  ;;  %v936_v28 = vmul.f32 0.1, %v918_v24  ;;  %v947_v29 = vsel %vm931_vm12, %v885_v21, %v939_v25 }
 0x113   : > { %1276 = vst [vmem:[%s1791_s24 + $0x60] sm:$0xff] %v947_v29  ;;  %v901_v31 = vadd.f32 %v900_v26, %v704_v61 }
 0x114   : > { %v944_v30 = vsel %vm928_vm13, %v918_v24, %v936_v28 }
 0x115   : > { %1273 = vst [vmem:[%s1791_s24 + $0x48] sm:$0xff] %v944_v30  ;;  %v886_v33 = vpop.f32.mrf.mxu3 }
 0x116   : > { %v887_v34 = vadd.f32 %v886_v33, %v868_v32 }
 0x117   : > { %v919_v35 = vpop.f32.mrf.mxu2  ;;  %v903_v36 = vpop.f32.mrf.mxu1 }
 0x118   : > { %v920_v37 = vadd.f32 %v919_v35, %v901_v31  ;;  %vm933_vm14 = vcmp.gt.f32.partialorder %v887_v34, 0.0  ;;  %v941_v38 = vmul.f32 0.1, %v887_v34  ;;  %v904_v42 = vadd.f32 %v903_v36, %v709_v11 }
 0x11a   : > { %vm930_vm15 = vcmp.gt.f32.partialorder %v920_v37, 0.0  ;;  %v938_v39 = vmul.f32 0.1, %v920_v37  ;;  %v949_v40 = vsel %vm933_vm14, %v887_v34, %v941_v38 }
 0x11b   : > { %1278 = vst [vmem:[%s1791_s24 + $0x70] sm:$0xff] %v949_v40 }
 0x11c   : > { %v946_v41 = vsel %vm930_vm15, %v920_v37, %v938_v39 }
 0x11d   : > { %1275 = vst [vmem:[%s1791_s24 + $0x58] sm:$0xff] %v946_v41  ;;  %v922_v43 = vpop.f32.mrf.mxu3 }
 0x11e   : > { %v923_v44 = vadd.f32 %v922_v43, %v904_v42 }
 0x11f   : > { %v905_v46 = vpop.f32.mrf.mxu1 }
 0x120   : > { %vm932_vm0 = vcmp.gt.f32.partialorder %v923_v44, 0.0  ;;  %v940_v45 = vmul.f32 0.1, %v923_v44  ;;  %v906_v48 = vadd.f32 %v905_v46, %v714_v27 }
 0x122   : > { %v948_v47 = vsel %vm932_vm0, %v923_v44, %v940_v45 }
 0x123   : > { %1277 = vst [vmem:[%s1791_s24 + $0x68] sm:$0xff] %v948_v47 }
 0x125   : > { %v924_v49 = vpop.f32.mrf.mxu3 }
 0x126   : > { %v925_v50 = vadd.f32 %v924_v49, %v906_v48 }
 0x128   : > { %vm934_vm1 = vcmp.gt.f32.partialorder %v925_v50, 0.0  ;;  %v942_v51 = vmul.f32 0.1, %v925_v50 }
 0x12a   : > { %v950_v52 = vsel %vm934_vm1, %v925_v50, %v942_v51 }
 0x12b   : > { %1279 = vst [vmem:[%s1791_s24 + $0x78] sm:$0xff] %v950_v52 }
 0x12c   : > { %1421 = shalt.err (!%p1418_p5)
}
 0x12d   : > { %s1459_s4 = smov 256   ;;  %s1460_s19 = smov 512  }
 0x12e   : > { %s1461_s20 = smov 16  }
 0x12f   : > { %1348 = dma.vmem_to_hbm [thread:$0]  (%p1520_p6), %s974_s29, 2048, %s976_s30, %s961_s16, %s1459_s4, %s1460_s19, %s1461_s20  }
 0x130 PF: > { %s990_s6 = sand.u32 1, %s1444_s12   ;;  %p1351_p7 = pnand %p1046_p9, %p1524_p8 }
 0x131   : > { %s991_s24 = scalar_lea.sflag [#allocation4], %s990_s6 }
 0x132   : > { %p1352_p10 = pneg %p1351_p7 }
 0x134   : > { %1439 = dma.done.wait (%p1352_p10), %s991_s24, 2048  }
 0x135   : > { %1441 = vsyncadd (%p1352_p10), %s991_s24, 4294965248  ;;  %p13_p11 = scmp.ge.s32.totalorder %s1505_s18, 4   ;;  %s1853_s12 = smov %s1448_s13 }
 0x136   : > { %s1854_s13 = smov %s1452_s14  ;;  %s1855_s14 = smov %s1518_s21 }
 0x137   : > { %s1856_s15 = smov %s1505_s18  ;;  %15 = sbr.rel (!%p13_p11) target bundleno = 3 (0x3), region = 112 }
 0x13c   :  { %997 = vsyncpa [#allocation4], 1 }
 0x13d   :  { %999 = vsyncpa [#allocation4 + $0x1], 1 }

</bundles_post_ra>
